<compile_context>
chip_gen: v5e
topology: v5e:2x2
jax: 0.10.0
libtpu: 0.0.40
codegen_flags: <defaults>
</compile_context>

<pallas_src>
import jax
import jax.numpy as jnp
from jax import lax
from jax.experimental import pallas as pl
from jax.experimental.pallas import tpu as pltpu

_LANES = 128
_SUBLANES = 8
_MAX_TILE_ROWS = 2048   # (2048,128) f32 tile = 1 MiB per input
_CHAINS = 4             # independent accumulator chains (fills the 4 VALU slots)


def _round_up(x, m):
    return -(-x // m) * m


def _sublane_mult(dtype):
    """Packed sublane multiple: 8 rows for 4-byte, 16 for 2-byte, 32 for 1-byte dtypes."""
    return max(_SUBLANES, (4 * _SUBLANES) // jnp.dtype(dtype).itemsize)


def _fold_to_sublanes(x):
    """(s_rows, 128) -> (8, 128) by pairwise adds (s_rows is 8 / 16 / 32)."""
    r = x.shape[0]
    while r > _SUBLANES:
        half = r // 2
        x = x[:half] + x[half:]
        r = half
    return x


def _accumulate_tile(slice_fn, n_slices, s_rows, n_out):
    """Sum slice_fn(row_offset) over the whole tile.

    slice_fn(off) -> tuple of n_out (8,128) f32 partials for the s_rows rows
    starting at `off`.  Uses up to _CHAINS independent accumulator chains inside
    a fully-unrolled fori_loop so live ranges stay at a handful of vregs and the
    VALU dependency chain stays short.
    """
    chains = min(_CHAINS, n_slices)
    zero = jnp.zeros((_SUBLANES, _LANES), jnp.float32)
    accs = [zero] * (n_out * chains)

    n_groups = n_slices // chains
    rem = n_slices - n_groups * chains

    def body(g, carry):
        carry = list(carry)
        base = g * (chains * s_rows)
        for c in range(chains):
            off = pl.multiple_of(base + c * s_rows, s_rows)
            vals = slice_fn(off)
            for o in range(n_out):
                carry[o * chains + c] = carry[o * chains + c] + vals[o]
        return tuple(carry)

    accs = list(lax.fori_loop(0, n_groups, body, tuple(accs), unroll=True))

    for r in range(rem):                      # leftover slices (static Python loop)
        off = (n_groups * chains + r) * s_rows
        vals = slice_fn(off)
        for o in range(n_out):
            accs[o * chains + r] = accs[o * chains + r] + vals[o]

    outs = []
    for o in range(n_out):                    # combine chains with a balanced tree
        chain = accs[o * chains:(o + 1) * chains]
        while len(chain) > 1:
            nxt = [chain[i] + chain[i + 1] for i in range(0, len(chain) - 1, 2)]
            if len(chain) % 2:
                nxt.append(chain[-1])
            chain = nxt
        outs.append(chain[0])
    return tuple(outs)


def _make_color_kernel(rows, tile_rows, s_rows, need_mask):
    n_slices = tile_rows // s_rows

    def kernel(pred_ref, gt_ref, out_ref):
        if need_mask:
            start = pl.program_id(0) * tile_rows
            limit = rows - start                  # valid rows left in this tile
            iota = lax.broadcasted_iota(jnp.int32, (s_rows, _LANES), 0)

        def slice_fn(off):
            p = pred_ref[pl.ds(off, s_rows), :].astype(jnp.float32)
            g = gt_ref[pl.ds(off, s_rows), :].astype(jnp.float32)
            d = jnp.abs(g - p)
            if need_mask:
                # where() (not multiply) so garbage in the OOB tail can't inject NaN/Inf
                d = jnp.where((iota + off) < limit, d, jnp.float32(0.0))
            return (_fold_to_sublanes(d),)

        (total,) = _accumulate_tile(slice_fn, n_slices, s_rows, 1)
        out_ref[0] = total

    return kernel


def _make_depth_kernel(rows, tile_rows, s_rows, need_mask, max_depth):
    n_slices = tile_rows // s_rows

    def kernel(pred_ref, gt_ref, sum_ref, cnt_ref):
        if need_mask:
            start = pl.program_id(0) * tile_rows
            limit = rows - start
            iota = lax.broadcasted_iota(jnp.int32, (s_rows, _LANES), 0)

        def slice_fn(off):
            g = gt_ref[pl.ds(off, s_rows), :].astype(jnp.float32)
            p = pred_ref[pl.ds(off, s_rows), :].astype(jnp.float32)
            valid = jnp.logical_and(g > jnp.float32(0.01), g < jnp.float32(max_depth))
            if need_mask:
                valid = jnp.logical_and(valid, (iota + off) < limit)
            d = jnp.where(valid, jnp.abs(g - p), jnp.float32(0.0))
            return (_fold_to_sublanes(d),
                    _fold_to_sublanes(valid.astype(jnp.float32)))

        s, c = _accumulate_tile(slice_fn, n_slices, s_rows, 2)
        sum_ref[0] = s
        cnt_ref[0] = c

    return kernel


def _prep_pair(a, b):
    """Flatten a matching (pred, gt) pair into lane-dense (rows,128) native-dtype slabs.

    Padding is at most one (sublane_mult x 128) vector tile (zero elements are
    harmless: 0 for the color diff, invalid for the depth mask); in the common
    aligned case the reshape is a zero-copy bitcast.  Tile-level raggedness
    (rows % tile_rows != 0) is handled by in-kernel masking, never by padding.
    """
    assert a.size == b.size
    n = int(a.size)
    s_mult = max(_sublane_mult(a.dtype), _sublane_mult(b.dtype))
    align = s_mult * _LANES
    padded = max(_round_up(n, align), align)
    rows = padded // _LANES
    tile_rows = rows if rows <= _MAX_TILE_ROWS else _MAX_TILE_ROWS
    num_tiles = pl.cdiv(rows, tile_rows)
    need_mask = (num_tiles * tile_rows != rows)

    s_rows = s_mult                                  # slice height inside the kernel
    if s_mult < 16 and tile_rows % (2 * s_mult) == 0:
        s_rows = 2 * s_mult                          # 16-row slices for f32 big tiles

    def slab(x):
        flat = x.reshape(-1)
        if padded != n:
            # TODO(synk): only copies when n % (s_mult*128) != 0; aligned case is free.
            flat = jnp.pad(flat, (0, padded - n))
        return flat.reshape(rows, _LANES)

    return slab(a), slab(b), rows, tile_rows, num_tiles, s_rows, need_mask


def _run_reduce(kernel, slabs, n_out, tile_rows, num_tiles, flops_per_elem):
    """Run a tiled partial-sum kernel; return fully-reduced f32 scalars."""
    out_shape = tuple(jax.ShapeDtypeStruct((num_tiles, _SUBLANES, _LANES), jnp.float32)
                      for _ in range(n_out))
    out_specs = tuple(pl.BlockSpec((1, _SUBLANES, _LANES), lambda i: (i, 0, 0))
                      for _ in range(n_out))
    if n_out == 1:
        out_shape, out_specs = out_shape[0], out_specs[0]

    bytes_accessed = sum(int(s.size) * s.dtype.itemsize for s in slabs) \
        + n_out * num_tiles * _SUBLANES * _LANES * 4

    outs = pl.pallas_call(
        kernel,
        out_shape=out_shape,
        grid_spec=pltpu.PrefetchScalarGridSpec(
            num_scalar_prefetch=0,
            grid=(num_tiles,),
            in_specs=[pl.BlockSpec((tile_rows, _LANES), lambda i: (i, 0)) for _ in slabs],
            out_specs=out_specs,
        ),
        compiler_params=pltpu.CompilerParams(
            dimension_semantics=("parallel",)),
        cost_estimate=pl.CostEstimate(
            flops=flops_per_elem * int(slabs[0].size),
            transcendentals=0,
            bytes_accessed=int(bytes_accessed)),
    )(*slabs)

    if n_out == 1:
        outs = (outs,)
    # Final cross-sublane/lane reduce on the tiny (num_tiles,8,128) partials in JAX.
    return tuple(jnp.sum(o) for o in outs)


def criterion_pallas(pred_color, pred_depth, img, depth, *,
                     rgb_weight, depth_weight, max_depth,
                     use_color_loss=True, use_depth_loss=True):
    """Pallas implementation of Criterion.forward.

    pred_color, img : (B, 3, H, W);  pred_depth, depth : (B, H, W)
    Returns (loss, loss_dict); loss_dict values stay jnp scalars (jit-able).
    """
    loss = jnp.float32(0.0)
    loss_dict = {}

    if use_color_loss:
        pc, gc, rows, tr, nt, sr, mask = _prep_pair(pred_color, img)
        kern = _make_color_kernel(rows, tr, sr, mask)
        (color_sum,) = _run_reduce(kern, (pc, gc), 1, tr, nt, 3)
        color_loss = color_sum / jnp.float32(img.size)
        loss = loss + jnp.float32(rgb_weight) * color_loss
        # Kept as jnp scalar (PyTorch used .item()); avoids host sync / jit break.
        loss_dict['color_loss'] = color_loss

    if use_depth_loss:
        pd, gd, rows, tr, nt, sr, mask = _prep_pair(pred_depth, depth)
        kern = _make_depth_kernel(rows, tr, sr, mask, float(max_depth))
        depth_sum, valid_cnt = _run_reduce(kern, (pd, gd), 2, tr, nt, 7)
        # NOTE: NaN when no pixel is valid, matching PyTorch's x[mask].mean().
        depth_loss = depth_sum / valid_cnt
        loss = loss + jnp.float32(depth_weight) * depth_loss
        loss_dict['depth_loss'] = depth_loss

    loss_dict['loss'] = loss
    return loss, loss_dict


def _reference(pred_color, pred_depth, img, depth, rgb_weight, depth_weight, max_depth):
    color_loss = jnp.mean(jnp.abs(img.astype(jnp.float32) -
                                  pred_color.astype(jnp.float32)))
    gt = depth.astype(jnp.float32)
    valid = (gt > 0.01) & (gt < max_depth)
    diff = jnp.abs(gt - pred_depth.astype(jnp.float32))
    depth_loss = jnp.sum(jnp.where(valid, diff, 0.0)) / jnp.sum(valid.astype(jnp.float32))
    return rgb_weight * color_loss + depth_weight * depth_loss


if __name__ == "__main__":
    max_depth = 10.0
    rgb_weight = 0.5
    depth_weight = 1.0

    # --- small deterministic test (matches the module's expected shapes) ---
    k1, k2, k3, k4 = jax.random.split(jax.random.PRNGKey(0), 4)
    B, C, H, W = 2, 3, 16, 16
    pred_color = jax.random.uniform(k1, (B, C, H, W), jnp.float32)
    img        = jax.random.uniform(k2, (B, C, H, W), jnp.float32)
    depth      = jax.random.uniform(k3, (B, H, W), jnp.float32,
                                    minval=-1.0, maxval=1.2 * max_depth)
    pred_depth = jax.random.uniform(k4, (B, H, W), jnp.float32,
                                    minval=0.0, maxval=max_depth)

    loss, loss_dict = criterion_pallas(
        pred_color, pred_depth, img, depth,
        rgb_weight=rgb_weight, depth_weight=depth_weight, max_depth=max_depth)
    jax.block_until_ready(loss)

    ref = _reference(pred_color, pred_depth, img, depth,
                     rgb_weight, depth_weight, max_depth)
    assert jnp.allclose(loss, ref, rtol=1e-5, atol=1e-5), (loss, ref)
    assert bool(jnp.isfinite(loss_dict['color_loss']))
    assert bool(jnp.isfinite(loss_dict['depth_loss']))

    # --- larger ragged shape: exercises the multi-tile path + in-kernel tail masking ---
    k5, k6, k7, k8 = jax.random.split(jax.random.PRNGKey(1), 4)
    B2, H2, W2 = 2, 224, 224
    pred_color2 = jax.random.uniform(k5, (B2, 3, H2, W2), jnp.float32)
    img2        = jax.random.uniform(k6, (B2, 3, H2, W2), jnp.float32)
    depth2      = jax.random.uniform(k7, (B2, H2, W2), jnp.float32,
                                     minval=-1.0, maxval=1.2 * max_depth)
    pred_depth2 = jax.random.uniform(k8, (B2, H2, W2), jnp.float32,
                                     minval=0.0, maxval=max_depth)
    loss2, _ = criterion_pallas(
        pred_color2, pred_depth2, img2, depth2,
        rgb_weight=rgb_weight, depth_weight=depth_weight, max_depth=max_depth)
    jax.block_until_ready(loss2)
    ref2 = _reference(pred_color2, pred_depth2, img2, depth2,
                      rgb_weight, depth_weight, max_depth)
    assert jnp.allclose(loss2, ref2, rtol=1e-5, atol=1e-5), (loss2, ref2)

    print("KERNEL_OK")
</pallas_src>

<mosaic_0001>
module attributes {stable_mosaic.version = 11 : i64} {
  func.func @kernel(%arg0: i32, %arg1: memref<16x128xf32, #tpu.memory_space<vmem>>, %arg2: memref<16x128xf32, #tpu.memory_space<vmem>>, %arg3: memref<1x8x128xf32, #tpu.memory_space<vmem>>) attributes {dimension_semantics = [#tpu.dimension_semantics<parallel>], iteration_bounds = array<i64: 1>, scalar_prefetch = 0 : i64, scratch_operands = 0 : i64, tpu.core_type = #tpu.core_type<tc>, window_params = [{transform_indices = @transform_0, window_bounds = array<i64: 16, 128>}, {transform_indices = @transform_1, window_bounds = array<i64: 16, 128>}, {transform_indices = @transform_2, window_bounds = array<i64: 1, 8, 128>}]} {
    %cst = arith.constant 0.000000e+00 : f32
    %0 = vector.broadcast %cst : f32 to vector<8x128xf32>
    %c0_i32 = arith.constant 0 : i32
    %c16_i32 = arith.constant 16 : i32
    %1 = arith.muli %c0_i32, %c16_i32 : i32
    %c0_i32_0 = arith.constant 0 : i32
    %2 = arith.addi %1, %c0_i32_0 : i32
    %3 = tpu.assume_multiple %2, 16 : i32
    %4 = arith.index_cast %3 : i32 to index
    %c0 = arith.constant 0 : index
    %5 = vector.load %arg1[%4, %c0] : memref<16x128xf32, #tpu.memory_space<vmem>>, vector<16x128xf32>
    %6 = arith.index_cast %3 : i32 to index
    %c0_1 = arith.constant 0 : index
    %7 = vector.load %arg2[%6, %c0_1] : memref<16x128xf32, #tpu.memory_space<vmem>>, vector<16x128xf32>
    %8 = arith.subf %7, %5 : vector<16x128xf32>
    %9 = math.absf %8 : vector<16x128xf32>
    %10 = vector.extract_strided_slice %9 {offsets = [0, 0], sizes = [8, 128], strides = [1, 1]} : vector<16x128xf32> to vector<8x128xf32>
    %11 = vector.extract_strided_slice %9 {offsets = [8, 0], sizes = [8, 128], strides = [1, 1]} : vector<16x128xf32> to vector<8x128xf32>
    %12 = arith.addf %10, %11 : vector<8x128xf32>
    %13 = arith.addf %0, %12 : vector<8x128xf32>
    %c1_i32 = arith.constant 1 : i32
    %c0_2 = arith.constant 0 : index
    %c0_3 = arith.constant 0 : index
    %c0_4 = arith.constant 0 : index
    %14 = vector.load %arg3[%c0_2, %c0_3, %c0_4] : memref<1x8x128xf32, #tpu.memory_space<vmem>>, vector<1x8x128xf32>
    %15 = vector.shape_cast %14 : vector<1x8x128xf32> to vector<8x128xf32>
    %16 = vector.shape_cast %13 : vector<8x128xf32> to vector<1x8x128xf32>
    tpu.vector_store %arg3[%c0_2, %c0_3, %c0_4], %16 {strides = array<i32>} : memref<1x8x128xf32, #tpu.memory_space<vmem>>, vector<1x8x128xf32>,
    return
  }
  func.func @transform_0(%arg0: i32) -> (i32, i32) {
    %c0_i32 = arith.constant 0 : i32
    %c0_i32_0 = arith.constant 0 : i32
    return %arg0, %c0_i32 : i32, i32
  }
  func.func @transform_1(%arg0: i32) -> (i32, i32) {
    %c0_i32 = arith.constant 0 : i32
    %c0_i32_0 = arith.constant 0 : i32
    return %arg0, %c0_i32 : i32, i32
  }
  func.func @transform_2(%arg0: i32) -> (i32, i32, i32) {
    %c0_i32 = arith.constant 0 : i32
    %c0_i32_0 = arith.constant 0 : i32
    %c0_i32_1 = arith.constant 0 : i32
    return %arg0, %c0_i32, %c0_i32_0 : i32, i32, i32
  }
}

</mosaic_0001>

<bundles_post_ra>
// kernel: tpu_custom_call.1
= control target key start
LH: loop header
LB: loop body
LE: loop exit
PB: predicated region body
PF: predicated region fallthrough
CT: control target
= control target key end

     0   :  { %7 = vsyncpa [#allocation3], 0  ;;  %s185_s0 = inlined_call_operand.hbm [shape: f32[16,128], index: 0, kind: input, shape index: {}]   ;;  %s186_s1 = inlined_call_operand.hbm [shape: f32[16,128], index: 1, kind: input, shape index: {}]   ;;  %s187_s2 = inlined_call_operand.hbm [shape: f32[1,8,128], index: 2, kind: output, shape index: {}]  }
   0x1   :  { %8 = vsyncpa [#allocation6], 0 }
   0x2   :  { %9 = vsyncpa [#allocation4], 0  ;;  %s14_s11 = sshll.u32 %s185_s0, 4  ;;  %s156_s12 = smov [#allocation2]   ;;  %s15_s11 = int_to_ptr.hbm [resolvable:$true] %s14_s11 }
   0x3   :  { %s16_s13 = sshll.u32 %s156_s12, 4  ;;  %s27_s16 = sshll.u32 %s186_s1, 4  ;;  %s17_s13 = int_to_ptr.vmem [resolvable:$true] %s16_s13  ;;  %s28_s16 = int_to_ptr.hbm [resolvable:$true] %s27_s16 }
   0x4   :  { %s157_s17 = smov 128   ;;  %s158_s18 = smov 8  }
   0x5   :  { %22 = dma.hbm_to_vmem [thread:$0]  %s15_s11, 256, %s17_s13, [#allocation3], %s157_s17, %s157_s17, %s158_s18  }
   0x6   :  { %s159_s19 = smov [#allocation5]  }
   0x7   :  { %s29_s20 = sshll.u32 %s159_s19, 4  ;;  %s30_s20 = int_to_ptr.vmem [resolvable:$true] %s29_s20 }
   0x8   :  { %35 = dma.hbm_to_vmem [thread:$0]  %s28_s16, 256, %s30_s20, [#allocation6], %s157_s17, %s157_s17, %s158_s18  }
   0x9   :  { %150 = dma.done.wait [#allocation3], 256  }
   0xa   :  { %151 = vsyncadd [#allocation3], 4294967040 }
   0xb   :  { %152 = dma.done.wait [#allocation6], 256  }
   0xc   :  { %153 = vsyncadd [#allocation6], 4294967040  ;;  %v44_v0 = vld [vmem:[#allocation2] sm:$0xff]  ;;  %v45_v1 = vld [vmem:[#allocation2 + $0x8] sm:$0xff]  ;;  %s160_s0 = smov [#allocation7]   ;;  %s62_s23 = sshll.u32 %s187_s2, 4  ;;  %s63_s23 = int_to_ptr.hbm [resolvable:$true] %s62_s23 }
   0xd   :  { %v46_v2 = vld [vmem:[#allocation5] sm:$0xff]  ;;  %v47_v3 = vld [vmem:[#allocation5 + $0x8] sm:$0xff]  ;;  %s60_s1 = sshll.u32 %s160_s0, 4  ;;  %s61_s1 = int_to_ptr.vmem [resolvable:$true] %s60_s1 }
   0xe   :  { %v48_v4 = vsub.f32 %v46_v2, %v44_v0  ;;  %v49_v5 = vsub.f32 %v47_v3, %v45_v1 }
  0x10   :  { %v50_v6 = vand.u32 2147483647, %v48_v4  ;;  %v51_v7 = vand.u32 2147483647, %v49_v5 }
  0x12   :  { %v52_v8 = vadd.f32 %v51_v7, %v50_v6 }
  0x14   :  { %54 = vst [vmem:[#allocation7] sm:$0xff] %v52_v8 }
  0x15   :  { %65 = dma.vmem_to_hbm [thread:$0]  %s61_s1, 128, %s63_s23, [#allocation4]  }
  0x16   :  { %154 = dma.done.wait [#allocation4], 128  }
  0x17   :  { %155 = vsyncadd [#allocation4], 4294967168 }
  0x18   :  { %70 = vsyncpa [#allocation3], 1 }
  0x19   :  { %71 = vsyncpa [#allocation6], 1 }
  0x1a   :  { %72 = vsyncpa [#allocation4], 1 }

</bundles_post_ra>
